<compile_context>
chip_gen: v7x
topology: tpu7x:2x2x1
jax: 0.10.0
libtpu: 0.0.40
codegen_flags: <defaults>
</compile_context>

<pallas_src>
import math

import jax
import jax.numpy as jnp
from jax.experimental import pallas as pl
from jax.experimental.pallas import tpu as pltpu


def _fusing_bi_kernel(u_ref, v_ref, w1_ref, b1_ref, w2_ref, b2_ref, o_ref):
    u = u_ref[...]                       # (tm, E) f32 user rows
    v = v_ref[...]                       # (tm, E) f32 item rows
    w1 = w1_ref[...]                     # (E, E)  bf16 resident weight panel
    b1 = b1_ref[...]                     # (1, E)  f32
    w2 = w2_ref[...]                     # (1, E)  f32 lane-dense Linear(E,1) weights
    b2 = b2_ref[0]                       # scalar bias from SMEM

    tm = u.shape[0]

    # One (2*tm, E) x (E, E) bf16 MXU matmul (f32 accumulation): W1 is pushed into the
    # MXU once per row tile and amortized across both stacked features.
    x = jnp.concatenate([u.astype(jnp.bfloat16), v.astype(jnp.bfloat16)], axis=0)
    h = jnp.maximum(jnp.dot(x, w1, preferred_element_type=jnp.float32) + b1, 0.0)

    # Linear(E, 1) as VPU multiply + XLU lane reduction (avoids a degenerate MXU matmul).
    s = jnp.sum(h * w2, axis=-1, keepdims=True) + b2          # (2*tm, 1) f32
    s_u = s[:tm]                                              # (tm, 1)
    s_v = s[tm:]                                              # (tm, 1)

    # Softmax over the stacked pair (dim 0 of the (2, B, 1) score tensor) -> row-local.
    m = jnp.maximum(s_u, s_v)
    e_u = jnp.exp(s_u - m)
    e_v = jnp.exp(s_v - m)
    inv = pl.reciprocal(e_u + e_v, approx=True)               # EUP slot, otherwise idle
    a_u = e_u * inv
    a_v = e_v * inv

    # transformed_outputs = sum(feature_score * stack_feature, dim=0), in f32.
    o_ref[...] = (a_u * u + a_v * v).astype(o_ref.dtype)


def embedding_fusing_bi(user_embedding, item_embedding, w1, b1, w2_row, b2,
                        *, block_rows=1024):
    """user_embedding, item_embedding: (B, E) f32 -> fused output (B, E) f32.

    w1: (E_in, E_out) so the kernel computes x @ w1 + b1 (transpose nn.Linear.weight).
    w2_row: (1, E) lane-dense row (== nn.Linear(E,1).weight). b2: (1,) scalar bias.
    """
    B, E = user_embedding.shape
    assert item_embedding.shape == (B, E)

    # Row tile: multiple of 8 sublanes; capped at ceil(B/2) (rounded up to 8) so the
    # "parallel" grid axis has >= 2 tiles and can be sharded across both TensorCores
    # on v7x. Negligible cost (~0.35us extra step) on 1-TC v5e/v6e.
    half_rows = ((pl.cdiv(B, 2) + 7) // 8) * 8
    tm = max(8, min(block_rows, half_rows))
    grid = (pl.cdiv(B, tm),)       # ragged last tile is masked by Pallas; math is row-local

    # Stream / hold W1 as bf16 (halves its DMA + VMEM); accumulation stays f32 in-kernel.
    w1_bf16 = w1.astype(jnp.bfloat16)

    row_spec = pl.BlockSpec((tm, E), lambda i: (i, 0))              # streamed per row tile
    resident = lambda shape: pl.BlockSpec(shape, lambda i: (0, 0))  # stays in VMEM

    # Tight VMEM budget: streamed tiles double-buffered + resident weights, 2x slack,
    # floor of 8 MiB, never above 64 MiB (v7x per-TC physical VMEM).
    itemsize = jnp.dtype(user_embedding.dtype).itemsize
    stream_bytes = 3 * 2 * tm * E * itemsize                  # u, v, out (double-buffered)
    resident_bytes = 2 * (E * E * 2 + 2 * E * 4)              # W1 (bf16) + b1/w2 (f32)
    vmem_limit = int(min(64 << 20, max(8 << 20, 2 * (stream_bytes + resident_bytes))))

    return pl.pallas_call(
        _fusing_bi_kernel,
        out_shape=jax.ShapeDtypeStruct((B, E), user_embedding.dtype),
        grid_spec=pltpu.PrefetchScalarGridSpec(
            num_scalar_prefetch=0,
            grid=grid,
            in_specs=[
                row_spec,                                     # user rows
                row_spec,                                     # item rows
                resident((E, E)),                             # W1 panel (bf16, resident)
                resident((1, E)),                             # b1
                resident((1, E)),                             # w2 row (lane-dense)
                pl.BlockSpec(memory_space=pltpu.MemorySpace.SMEM),  # b2 scalar
            ],
            out_specs=pl.BlockSpec((tm, E), lambda i: (i, 0)),
        ),
        compiler_params=pltpu.CompilerParams(
            dimension_semantics=("parallel",),                # megacore-shard row tiles
            vmem_limit_bytes=vmem_limit,
        ),
    )(user_embedding, item_embedding, w1_bf16, b1, w2_row, b2)


def _xavier_uniform(key, shape, fan_in, fan_out):
    bound = math.sqrt(6.0 / (fan_in + fan_out))
    return jax.random.uniform(key, shape, jnp.float32, -bound, bound)


if __name__ == "__main__":
    # Small shapes consistent with the module: batch B=16, embedding_size E=128.
    B, E = 16, 128
    key = jax.random.PRNGKey(0)
    ku, ki, kw1, kw2 = jax.random.split(key, 4)

    user = jax.random.normal(ku, (B, E), jnp.float32)
    item = jax.random.normal(ki, (B, E), jnp.float32)

    # Deterministic xavier-uniform-style weights, zero biases (matches init_weight).
    w1 = _xavier_uniform(kw1, (E, E), E, E)        # stored (E_in, E_out): x @ w1
    b1 = jnp.zeros((1, E), jnp.float32)
    w2_row = _xavier_uniform(kw2, (1, E), E, 1)    # Linear(E,1).weight, lane-dense
    b2 = jnp.zeros((1,), jnp.float32)

    out = embedding_fusing_bi(user, item, w1, b1, w2_row, b2)
    out = jax.block_until_ready(out)
    assert out.shape == (B, E)

    stack = jnp.stack([user, item], axis=0)                          # (2, B, E)

    # Reference A: same bf16-MXU-operand numerics as the kernel (tight tolerance).
    h16 = jnp.maximum(
        jnp.dot(stack.astype(jnp.bfloat16), w1.astype(jnp.bfloat16),
                preferred_element_type=jnp.float32) + b1, 0.0)
    s16 = h16 @ w2_row.T + b2
    ref_a = jnp.sum(jax.nn.softmax(s16, axis=0) * stack, axis=0)
    assert jnp.allclose(out, ref_a, atol=1e-2, rtol=1e-2), float(jnp.max(jnp.abs(out - ref_a)))

    # Reference B: faithful f32 PyTorch-module math (looser tol: kernel uses bf16 MXU operands).
    h = jnp.maximum(stack @ w1 + b1, 0.0)                            # Linear + ReLU
    s = h @ w2_row.T + b2                                            # Linear(E,1) -> (2, B, 1)
    ref_b = jnp.sum(jax.nn.softmax(s, axis=0) * stack, axis=0)       # (B, E)
    assert jnp.allclose(out, ref_b, atol=5e-2, rtol=5e-2), float(jnp.max(jnp.abs(out - ref_b)))

    print("KERNEL_OK")
</pallas_src>

<mosaic_0001>
module attributes {stable_mosaic.version = 11 : i64} {
  func.func @_fusing_bi_kernel(%arg0: i32, %arg1: memref<8x128xf32, #tpu.memory_space<vmem>>, %arg2: memref<8x128xf32, #tpu.memory_space<vmem>>, %arg3: memref<128x128xbf16, #tpu.memory_space<vmem>>, %arg4: memref<1x128xf32, #tpu.memory_space<vmem>>, %arg5: memref<1x128xf32, #tpu.memory_space<vmem>>, %arg6: memref<1xf32, #tpu.memory_space<smem>>, %arg7: memref<8x128xf32, #tpu.memory_space<vmem>>) attributes {dimension_semantics = [#tpu.dimension_semantics<parallel>], iteration_bounds = array<i64: 2>, scalar_prefetch = 0 : i64, scratch_operands = 0 : i64, tpu.core_type = #tpu.core_type<tc>, window_params = [{transform_indices = @transform_0, window_bounds = array<i64: 8, 128>}, {transform_indices = @transform_1, window_bounds = array<i64: 8, 128>}, {pipeline_mode = #tpu.pipeline_mode<synchronous>, transform_indices = @transform_2, window_bounds = array<i64: 128, 128>}, {pipeline_mode = #tpu.pipeline_mode<synchronous>, transform_indices = @transform_3, window_bounds = array<i64: 1, 128>}, {pipeline_mode = #tpu.pipeline_mode<synchronous>, transform_indices = @transform_4, window_bounds = array<i64: 1, 128>}, {transform_indices = @transform_5, window_bounds = array<i64: 1>}, {transform_indices = @transform_6, window_bounds = array<i64: 8, 128>}]} {
    %c0 = arith.constant 0 : index
    %c0_0 = arith.constant 0 : index
    %0 = vector.load %arg1[%c0, %c0_0] : memref<8x128xf32, #tpu.memory_space<vmem>>, vector<8x128xf32>
    %c0_1 = arith.constant 0 : index
    %c0_2 = arith.constant 0 : index
    %1 = vector.load %arg2[%c0_1, %c0_2] : memref<8x128xf32, #tpu.memory_space<vmem>>, vector<8x128xf32>
    %c0_3 = arith.constant 0 : index
    %c0_4 = arith.constant 0 : index
    %2 = vector.load %arg3[%c0_3, %c0_4] : memref<128x128xbf16, #tpu.memory_space<vmem>>, vector<128x128xbf16>
    %c0_5 = arith.constant 0 : index
    %c0_6 = arith.constant 0 : index
    %3 = vector.load %arg4[%c0_5, %c0_6] : memref<1x128xf32, #tpu.memory_space<vmem>>, vector<1x128xf32>
    %c0_7 = arith.constant 0 : index
    %c0_8 = arith.constant 0 : index
    %4 = vector.load %arg5[%c0_7, %c0_8] : memref<1x128xf32, #tpu.memory_space<vmem>>, vector<1x128xf32>
    %c0_9 = arith.constant 0 : index
    %5 = memref.load %arg6[%c0_9] : memref<1xf32, #tpu.memory_space<smem>>
    %6 = arith.truncf %0 : vector<8x128xf32> to vector<8x128xbf16>
    %7 = arith.truncf %1 : vector<8x128xf32> to vector<8x128xbf16>
    %8 = tpu.concatenate %6, %7 in 0 : vector<8x128xbf16>, vector<8x128xbf16> -> vector<16x128xbf16>
    %cst = arith.constant dense<0.000000e+00> : vector<16x128xf32>
    %9 = tpu.matmul %8, %2, %cst {dimension_numbers = #tpu.dot_dimension_numbers<[1], [0], [0], [1], [0, 0, 1, 1], [], []>} : vector<16x128xbf16>, vector<128x128xbf16>, vector<16x128xf32> -> vector<16x128xf32>
    %10 = vector.broadcast %3 : vector<1x128xf32> to vector<16x128xf32>
    %11 = arith.addf %9, %10 : vector<16x128xf32>
    %cst_10 = arith.constant 0.000000e+00 : f32
    %12 = vector.broadcast %cst_10 : f32 to vector<16x128xf32>
    %13 = arith.maximumf %11, %12 : vector<16x128xf32>
    %14 = vector.broadcast %4 : vector<1x128xf32> to vector<16x128xf32>
    %15 = arith.mulf %13, %14 : vector<16x128xf32>
    %cst_11 = arith.constant dense<0.000000e+00> : vector<16xf32>
    %16 = vector.multi_reduction <add>, %15, %cst_11 [1] : vector<16x128xf32> to vector<16xf32>
    %17 = vector.shape_cast %16 : vector<16xf32> to vector<16x1xf32>
    %18 = vector.broadcast %5 : f32 to vector<16x1xf32>
    %19 = arith.addf %17, %18 : vector<16x1xf32>
    %20 = vector.extract_strided_slice %19 {offsets = [0, 0], sizes = [8, 1], strides = [1, 1]} : vector<16x1xf32> to vector<8x1xf32>
    %21 = vector.extract_strided_slice %19 {offsets = [8, 0], sizes = [8, 1], strides = [1, 1]} : vector<16x1xf32> to vector<8x1xf32>
    %22 = arith.maximumf %20, %21 : vector<8x1xf32>
    %23 = arith.subf %20, %22 : vector<8x1xf32>
    %24 = math.exp %23 : vector<8x1xf32>
    %25 = arith.subf %21, %22 : vector<8x1xf32>
    %26 = math.exp %25 : vector<8x1xf32>
    %27 = arith.addf %24, %26 : vector<8x1xf32>
    %28 = tpu.reciprocal %27 {approx = true} : vector<8x1xf32> -> vector<8x1xf32>
    %29 = arith.mulf %24, %28 : vector<8x1xf32>
    %30 = arith.mulf %26, %28 : vector<8x1xf32>
    %31 = vector.broadcast %29 : vector<8x1xf32> to vector<8x128xf32>
    %32 = arith.mulf %31, %0 : vector<8x128xf32>
    %33 = vector.broadcast %30 : vector<8x1xf32> to vector<8x128xf32>
    %34 = arith.mulf %33, %1 : vector<8x128xf32>
    %35 = arith.addf %32, %34 : vector<8x128xf32>
    %c0_12 = arith.constant 0 : index
    %c0_13 = arith.constant 0 : index
    %36 = vector.load %arg7[%c0_12, %c0_13] : memref<8x128xf32, #tpu.memory_space<vmem>>, vector<8x128xf32>
    tpu.vector_store %arg7[%c0_12, %c0_13], %35 {strides = array<i32>} : memref<8x128xf32, #tpu.memory_space<vmem>>, vector<8x128xf32>,
    return
  }
  func.func @transform_0(%arg0: i32) -> (i32, i32) {
    %c0_i32 = arith.constant 0 : i32
    %c0_i32_0 = arith.constant 0 : i32
    return %arg0, %c0_i32 : i32, i32
  }
  func.func @transform_1(%arg0: i32) -> (i32, i32) {
    %c0_i32 = arith.constant 0 : i32
    %c0_i32_0 = arith.constant 0 : i32
    return %arg0, %c0_i32 : i32, i32
  }
  func.func @transform_2(%arg0: i32) -> (i32, i32) {
    %c0_i32 = arith.constant 0 : i32
    %c0_i32_0 = arith.constant 0 : i32
    %c0_i32_1 = arith.constant 0 : i32
    return %c0_i32, %c0_i32_0 : i32, i32
  }
  func.func @transform_3(%arg0: i32) -> (i32, i32) {
    %c0_i32 = arith.constant 0 : i32
    %c0_i32_0 = arith.constant 0 : i32
    %c0_i32_1 = arith.constant 0 : i32
    return %c0_i32, %c0_i32_0 : i32, i32
  }
  func.func @transform_4(%arg0: i32) -> (i32, i32) {
    %c0_i32 = arith.constant 0 : i32
    %c0_i32_0 = arith.constant 0 : i32
    %c0_i32_1 = arith.constant 0 : i32
    return %c0_i32, %c0_i32_0 : i32, i32
  }
  func.func @transform_5(%arg0: i32) -> i32 {
    %c0_i32 = arith.constant 0 : i32
    %c0_i32_0 = arith.constant 0 : i32
    return %c0_i32 : i32
  }
  func.func @transform_6(%arg0: i32) -> (i32, i32) {
    %c0_i32 = arith.constant 0 : i32
    %c0_i32_0 = arith.constant 0 : i32
    return %arg0, %c0_i32 : i32, i32
  }
}

</mosaic_0001>

<bundles_post_ra>
// kernel: tpu_custom_call.1
= control target key start
LH: loop header
LB: loop body
LE: loop exit
PB: predicated region body
PF: predicated region fallthrough
CT: control target
= control target key end

     0   :  { %s1182_s0 = inlined_call_operand.hbm [shape: f32[16,128], index: 0, kind: input, shape index: {}]   ;;  %s1183_s1 = inlined_call_operand.hbm [shape: f32[16,128], index: 1, kind: input, shape index: {}]   ;;  %s1184_s2 = inlined_call_operand.hbm [shape: bf16[128,128], index: 2, kind: input, shape index: {}]   ;;  %s1185_s3 = inlined_call_operand.vmem [shape: f32[1,128], index: 3, kind: input, shape index: {}]   ;;  %s1186_s4 = inlined_call_operand.vmem [shape: f32[1,128], index: 4, kind: input, shape index: {}]   ;;  %s1187_s5 = inlined_call_operand.<no memory space> [shape: f32[1], index: 5, kind: input, shape index: {}]   ;;  %s1188_s6 = inlined_call_operand.hbm [shape: f32[16,128], index: 6, kind: output, shape index: {}]  }
   0x1   :  { %1193 = sst [smem:[#allocation15_spill]] %s1184_s2 }
   0x2   :  { %11 = sst [smem:[#allocation2]] %s1187_s5 }
   0x3   :  { %12 = vsyncpa [#allocation4], 0 }
   0x4   :  { %14 = vsyncpa [#allocation4 + $0x1], 0 }
   0x5   :  { %15 = vsyncpa [#allocation7], 0 }
   0x6   :  { %17 = vsyncpa [#allocation7 + $0x1], 0 }
   0x7   :  { %18 = vsyncpa [#allocation5], 0 }
   0x8   :  { %20 = vsyncpa [#allocation5 + $0x1], 0  ;;  %s939_s23 = smov 0   ;;  %s941_s24 = smov 0  }
   0x9   :  { %s943_s25 = smov 0   ;;  %s945_s26 = smov 0  }
   0xa LB: > { %s960_s5 = sadd.s32 4294967295, %s891_s26   ;;  %s593_s27 = sadd.s32 4294967294, %s891_s26   ;;  %s891_s26 = sphi %s945_s26, %s1214_s26   ;;  %s887_s25 = sphi %s943_s25, %s1213_s25   ;;  %s883_s24 = sphi %s941_s24, %s1212_s24   ;;  %s879_s23 = sphi %s939_s23, %s1211_s23  }
   0xb   : > { %p46_p0 = scmp.ne.s32.totalorder %s883_s24, %s879_s23  ;;  %p1189_p1 = scmp.eq.s32.totalorder %s960_s5, 0 }
   0xc   : > { %p186_p3 = scmp.eq.s32.totalorder %s593_s27, 1  ;;  %p594_p5 = scmp.ge.s32.totalorder %s891_s26, 1 }
   0xd   : > { %p969_p4 = por %p1189_p1, %p46_p0  ;;  %p193_p7 = scmp.lt.s32.totalorder %s891_s26, 3 }
   0xe   : > { %p974_p6 = por %p186_p3, %p46_p0  ;;  %s893_s7 = smov [#allocation8]  }
   0xf   : > { %s1194_s28 = scalar_select %p969_p4, 1, 0 }
  0x10   : > { %s1195_s29 = scalar_select %p974_p6, 1, 0 }
  0x11   : > { %p979_p8 = pnand %p594_p5, %p193_p7  ;;  %s205_s8 = sshll.u32 %s893_s7, 4  ;;  %s983_s8 = int_to_ptr.vmem [resolvable:$true] %s205_s8 }
  0x12   : > { %s995_s10 = sadd.s32 1, %s891_s26   ;;  %s33_s11 = sadd.s32 1, %s887_s25 }
  0x13   : > { %s1196_s30 = scalar_select %p979_p8, 1, 0 }
  0x14   : > { %p659_p9 = pneg %p979_p8  ;;  %s30_s12 = ssub.s32 %s891_s26, %s995_s10 }
  0x15   : > { %s1198_s2 = sld [smem:[#allocation15_spill]] }
  0x16   : > { %p990_p11 = pnand %p659_p9, %p1189_p1 }
  0x18   : > { %p731_p13 = pneg %p990_p11 }
  0x1b   : > { %s729_s15 = scalar_lea.hbm %s1198_s2, 1024 }
  0x1c   : > { %p730_p12 = scmp.ne.s32.totalorder %s1198_s2, %s729_s15  ;;  %p736_p5 = scmp.lt.u32.totalorder %s729_s15, %s1198_s2 }
  0x1e   : > { %p732_p0 = pnand %p731_p13, %p730_p12 }
  0x20   : > { %p733_p3 = pneg %p732_p0 }
  0x22   : > { %p738_p7 = pnand %p736_p5, %p733_p3 }
  0x24   : > { %741 = shalt.err (!%p738_p7)
}
  0x25   : > { %s742_s20 = scalar_lea.vmem %s983_s8, 1024  ;;  %p750_p2 = scmp.lt.s32.totalorder %s983_s8, %s983_s8 }
  0x26   : > { %p743_p9 = scmp.ne.s32.totalorder %s983_s8, %s742_s20  ;;  %p751_p6 = scmp.lt.s32.totalorder %s742_s20, %s742_s20 }
  0x28   : > { %p745_p10 = pnand %p743_p9, %p731_p13  ;;  %p752_p4 = por %p751_p6, %p750_p2 }
  0x2a   : > { %p746_p1 = pneg %p745_p10 }
  0x2c   : > { %p753_p8 = pnand %p752_p4, %p746_p1 }
  0x2e   : > { %756 = shalt.err (!%p753_p8)
}
  0x2f   : > { %s894_s21 = smov 64   ;;  %s895_s22 = smov 4  }
  0x30   : > { %662 = dma.hbm_to_vmem [thread:$0]  (!%p990_p11), %s1198_s2, 1024, %s983_s8, [#allocation7], %s894_s21, %s894_s21, %s895_s22  }
  0x31   : > { %p31_p2 = scmp.eq.s32.totalorder %s30_s12, 0  ;;  %p40_p1 = scmp.ne.s32.totalorder %s887_s25, %s883_s24 }
  0x32   : > { %p41_p4 = scmp.eq.s32.totalorder %s891_s26, 0  ;;  %p675_p6 = scmp.lt.s32.totalorder %s891_s26, 2 }
  0x33   : > { %s1026_s13 = scalar_select %p31_p2, %s887_s25, %s33_s11  }
  0x34   : > { %p42_p8 = por %p41_p4, %p40_p1  ;;  %p1200_p10 = scmp.eq.s32.totalorder %s960_s5, 1 }
  0x35   : > { %1199 = sst [smem:[#allocation14_spill]] %s1026_s13  ;;  %s228_s15 = sand.u32 1, %s887_s25  }
  0x36   : > { %p1030_p12 = por %p1200_p10, %p40_p1  ;;  %s598_s16 = sshll.u32 %s891_s26, 7 }
  0x37   : > { %s1036_s17 = sshll.u32 %s228_s15, 3  ;;  %s1041_s8 = scalar_lea.hbm %s1182_s0, %s598_s16 }
  0x38   : > { %s1201_s14 = scalar_select %p1030_p12, 1, 0 }
  0x39   : > { %s232_s11 = scalar_lea.vmem [#allocation3], %s1036_s17  ;;  %p1044_p11 = pnand %p675_p6, %p42_p8 }
  0x3a   : > { %s239_s12 = sshll.u32 %s232_s11, 4  ;;  %s1053_s22 = scalar_lea.hbm %s1183_s1, %s598_s16  ;;  %s1048_s12 = int_to_ptr.vmem [resolvable:$true] %s239_s12 }
  0x3b   : > { %s229_s27 = scalar_lea.sflag [#allocation4], %s228_s15  ;;  %s757_s7 = scalar_lea.hbm %s1041_s8, 128 }
  0x3c   : > { %p758_p13 = scmp.ne.s32.totalorder %s1041_s8, %s757_s7  ;;  %p759_p0 = pneg %p1044_p11 }
  0x3d   : > { %s762_s11 = scalar_lea.hbm %s1182_s0, 256  ;;  %p763_p7 = scmp.lt.u32.totalorder %s1041_s8, %s1182_s0 }
  0x3e   : > { %p760_p3 = pnand %p759_p0, %p758_p13  ;;  %p764_p9 = scmp.lt.u32.totalorder %s762_s11, %s757_s7 }
  0x3f   : > { %p766_p1 = scmp.lt.u32.totalorder %s757_s7, %s1041_s8 }
  0x40   : > { %p761_p5 = pneg %p760_p3  ;;  %p765_p2 = por %p764_p9, %p763_p7 }
  0x42   : > { %p767_p4 = por %p766_p1, %p765_p2 }
  0x44   : > { %p768_p6 = pnand %p767_p4, %p761_p5 }
  0x46   : > { %771 = shalt.err (!%p768_p6)
}
  0x47   : > { %s772_s15 = scalar_lea.vmem %s1048_s12, 128  ;;  %s896_s16 = smov [#allocation3]  }
  0x48   : > { %p773_p8 = scmp.ne.s32.totalorder %s1048_s12, %s772_s15  ;;  %s777_s20 = sshll.u32 %s896_s16, 4  ;;  %s778_s20 = int_to_ptr.vmem [resolvable:$false] %s777_s20 }
  0x49   : > { %s779_s2 = scalar_lea.vmem %s778_s20, 256  ;;  %p780_p3 = scmp.lt.s32.totalorder %s1048_s12, %s778_s20 }
  0x4a   : > { %p775_p10 = pnand %p773_p8, %p759_p0  ;;  %p781_p7 = scmp.lt.s32.totalorder %s779_s2, %s772_s15 }
  0x4c   : > { %p776_p13 = pneg %p775_p10  ;;  %p782_p9 = por %p781_p7, %p780_p3 }
  0x4e   : > { %p783_p2 = pnand %p782_p9, %p776_p13 }
  0x50   : > { %786 = shalt.err (!%p783_p2)
}
  0x51   : > { %666 = dma.hbm_to_vmem [thread:$0]  (!%p1044_p11), %s1041_s8, 128, %s1048_s12, %s229_s27  }
  0x52   : > { %s246_s13 = sand.u32 1, %s891_s26   ;;  %s250_s21 = scalar_lea.vmem [#allocation6], %s1036_s17 }
  0x53   : > { %s257_s7 = sshll.u32 %s250_s21, 4  ;;  %s247_s9 = scalar_lea.sflag [#allocation7], %s246_s13  ;;  %s258_s7 = int_to_ptr.vmem [resolvable:$true] %s257_s7 }
  0x54   : > { %s787_s18 = scalar_lea.hbm %s1053_s22, 128  ;;  %s792_s16 = scalar_lea.hbm %s1183_s1, 256 }
  0x55   : > { %p788_p5 = scmp.ne.s32.totalorder %s1053_s22, %s787_s18  ;;  %p793_p6 = scmp.lt.u32.totalorder %s1053_s22, %s1183_s1 }
  0x56   : > { %p794_p8 = scmp.lt.u32.totalorder %s792_s16, %s787_s18  ;;  %p796_p13 = scmp.lt.u32.totalorder %s787_s18, %s1053_s22 }
  0x57   : > { %p790_p1 = pnand %p788_p5, %p759_p0 }
  0x58   : > { %p795_p10 = por %p794_p8, %p793_p6 }
  0x59   : > { %p791_p4 = pneg %p790_p1 }
  0x5a   : > { %p797_p3 = por %p796_p13, %p795_p10 }
  0x5c   : > { %p798_p7 = pnand %p797_p3, %p791_p4 }
  0x5e   : > { %801 = shalt.err (!%p798_p7)
}
  0x5f   : > { %s802_s17 = scalar_lea.vmem %s258_s7, 128  ;;  %s897_s8 = smov [#allocation6]  }
  0x60   : > { %p803_p9 = scmp.ne.s32.totalorder %s258_s7, %s802_s17  ;;  %s807_s12 = sshll.u32 %s897_s8, 4  ;;  %s808_s12 = int_to_ptr.vmem [resolvable:$false] %s807_s12 }
  0x61   : > { %s809_s27 = scalar_lea.vmem %s808_s12, 256  ;;  %p810_p1 = scmp.lt.s32.totalorder %s258_s7, %s808_s12 }
  0x62   : > { %p805_p2 = pnand %p803_p9, %p759_p0  ;;  %p811_p12 = scmp.lt.s32.totalorder %s809_s27, %s802_s17 }
  0x64   : > { %p806_p5 = pneg %p805_p2  ;;  %p812_p6 = por %p811_p12, %p810_p1 }
  0x66   : > { %p813_p8 = pnand %p812_p6, %p806_p5 }
  0x68   : > { %816 = shalt.err (!%p813_p8)
}
  0x69   : > { %669 = dma.hbm_to_vmem [thread:$0]  (!%p1044_p11), %s1053_s22, 128, %s258_s7, %s247_s9  }
  0x6a   : > { %p1203_p4 = scmp.ne.s32.totalorder %s1196_s30, 0 }
  0x6b   : > { %s1104_s13 = sand.u32 (!%p1203_p4), 1, %s883_s24   ;;  %p1204_p12 = scmp.ne.s32.totalorder (!%p1203_p4), %s1194_s28, 0 }
  0x6c   : > { %266 = sbr.rel (%p1203_p4) target bundleno = 572 (0x23c), region = 44  ;;  %s1107_s21 = sshll.u32 (!%p1203_p4), %s1104_s13, 3 }
  0x6d   : > { %s269_s18 = scalar_lea.sflag (!%p1203_p4), [#allocation4], %s1104_s13  ;;  %s272_s11 = scalar_lea.vmem (!%p1203_p4), [#allocation3], %s1107_s21 }
  0x73   : > { %862 = dma.done.wait (%p1204_p12), %s269_s18, 128  }
  0x74   : > { %864 = vsyncadd (%p1204_p12), %s269_s18, 4294967168  ;;  %s277_s30 = sand.u32 1, %s960_s5   ;;  %s281_s22 = scalar_lea.vmem [#allocation6], %s1107_s21 }
  0x75   : > { %s278_s19 = scalar_lea.sflag [#allocation7], %s277_s30 }
  0x76   : > { %866 = dma.done.wait (%p1204_p12), %s278_s19, 128  }
  0x77   : > { %868 = vsyncadd (%p1204_p12), %s278_s19, 4294967168  ;;  %p1205_p11 = scmp.eq.s32.totalorder %s960_s5, 0 }
  0x79   : > { %870 = dma.done.wait (%p1205_p11), [#allocation7], 1024   ;;  %p1206_p0 = pmov %p1205_p11 }
  0x7a   : > { %v898_v0 = vmov 0.0   ;;  %vm899_vm0 = vmmov 0   ;;  %v715_v1 = vld [vmem:[#allocation8] sm:$0xff]   ;;  %v716_v2 = vld [vmem:[#allocation8 + $0x8] sm:$0xff]   ;;  %v717_v3 = vld [vmem:[#allocation8 + $0x10] sm:$0xff]   ;;  %vm345_vm1 = vcmask 1043456  }
  0x7b   : > { %872 = vsyncadd (%p1206_p0), [#allocation7], 4294966272  ;;  %629 = vmatprep.subr.bf16.mxu0 %v898_v0  ;;  %645 = vmatprep.mubr.msk.bf16.mxu0 %vm899_vm0, %v898_v0  ;;  %v718_v4 = vld [vmem:[#allocation8 + $0x18] sm:$0xff]   ;;  %v719_v5 = vld [vmem:[#allocation8 + $0x20] sm:$0xff]   ;;  %s340_s16 = sld [smem:[#allocation2]]  ;;  %s617_s20 = sshll.u32 %s960_s5, 7 }
  0x7c   : > { %630 = vmatpush3.bf16.msra.mxu0 %v715_v1  ;;  %v720_v6 = vld [vmem:[#allocation8 + $0x28] sm:$0xff]   ;;  %v321_v7 = vld [vmem:[%s281_s22] sm:$0xff]  ;;  %v606_v15 = vld [vmem:[%s1185_s3] ss:$0 sm:$0xff]  ;;  %s318_s2 = scalar_lea.vmem [#allocation9], %s1107_s21  ;;  %s1138_s27 = scalar_lea.hbm %s1188_s6, %s617_s20 }
  0x7d   : > { %631 = vmatprep.subr.bf16.mxu0 %v898_v0  ;;  %v721_v8 = vld [vmem:[#allocation8 + $0x30] sm:$0xff]   ;;  %v342_v9 = vpack.c.bf16 %v321_v7, %v321_v7  ;;  %v320_v10 = vld [vmem:[%s272_s11] sm:$0xff]  ;;  %v722_v11 = vld [vmem:[#allocation8 + $0x38] sm:$0xff]   ;;  %s491_s17 = sshll.u32 %s318_s2, 4  ;;  %s478_s18 = scalar_lea.sflag [#allocation5], %s1104_s13  ;;  %s1140_s17 = int_to_ptr.vmem [resolvable:$true] %s491_s17 }
  0x7e   : > { %v341_v12 = vpack.c.bf16 %v320_v10, %v320_v10  ;;  %v615_v20 = vld [vmem:[%s1186_s4] ss:$0 sm:$0xff]  ;;  %s817_s11 = scalar_lea.vmem %s1140_s17, 128  ;;  %p1207_p13 = scmp.ne.s32.totalorder %s1201_s14, 0 }
  0x7f   : > { %v344_v13 = vrot.slane %v342_v9, 4  ;;  %p818_p10 = scmp.ne.s32.totalorder %s1140_s17, %s817_s11  ;;  %s900_s5 = smov [#allocation9]  }
  0x80   : > { %632 = vmatpush3.bf16.msra.mxu0 %v716_v2  ;;  %s821_s21 = sshll.u32 %s900_s5, 4  ;;  %s822_s21 = int_to_ptr.vmem [resolvable:$false] %s821_s21 }
  0x81   : > { %633 = vmatprep.subr.bf16.mxu0 %v898_v0  ;;  %v348_v14 = vsel %vm345_vm1, %v341_v12, %v344_v13  ;;  %v459_v28 = vstv %s340_s16  ;;  %p819_p3 = pnand %p818_p10, %p1207_p13  ;;  %s823_s30 = scalar_lea.vmem %s822_s21, 256 }
  0x82   : > { %p824_p9 = scmp.lt.s32.totalorder %s1140_s17, %s822_s21  ;;  %p825_p2 = scmp.lt.s32.totalorder %s823_s30, %s817_s11 }
  0x83   : > { %p820_p7 = pneg %p819_p3 }
  0x84   : > { %634 = vmatpush3.bf16.msra.mxu0 %v717_v3  ;;  %p826_p5 = por %p825_p2, %p824_p9 }
  0x85   : > { %635 = vmatprep.subr.bf16.mxu0 %v898_v0 }
  0x86   : > { %p827_p1 = pnand %p826_p5, %p820_p7 }
  0x88   : > { %636 = vmatpush3.bf16.msra.mxu0 %v718_v4 }
  0x89   : > { %637 = vmatprep.subr.bf16.mxu0 %v898_v0 }
  0x8c   : > { %638 = vmatpush3.bf16.msra.mxu0 %v719_v5 }
  0x8d   : > { %639 = vmatprep.subr.bf16.mxu0 %v898_v0 }
  0x90   : > { %640 = vmatpush3.bf16.msra.mxu0 %v720_v6 }
  0x91   : > { %641 = vmatprep.subr.bf16.mxu0 %v898_v0 }
  0x94   : > { %642 = vmatpush3.bf16.msra.mxu0 %v721_v8 }
  0x95   : > { %643 = vmatprep.subr.bf16.mxu0 %v898_v0 }
  0x98   : > { %644 = vmatpush3.bf16.msra.mxu0 %v722_v11 }
  0x9b   : > { %646 = vmatmul.mubr.bf16.vlgmr.msra.gmra.mrb[0].mxu0 %v348_v14 }
 0x16e   : > { %v438_v16 = vpop.f32.mrb[0].mxu0 }
 0x16f   : > { %v439_v17 = vadd.f32 %v606_v15, %v438_v16  ;;  %v647_v18 = vpop.f32.mrb[1].mxu0 }
 0x170   : > { %v441_v19 = vpop.f32.mrb[2].mxu0 }
 0x171   : > { %v445_v21 = vmax.f32 %v439_v17, 0.0  ;;  %v442_v22 = vadd.f32 %v606_v15, %v441_v19  ;;  %v648_v23 = vpop.f32.mrb[3].mxu0 }
 0x173   : > { %v446_v24 = vmax.f32 %v442_v22, 0.0  ;;  %v453_v25 = vmul.f32 %v615_v20, %v445_v21 }
 0x175   : > { %455 = vadd.xlane.f32.xlu0 %v453_v25  ;;  %v454_v26 = vmul.f32 %v615_v20, %v446_v24 }
 0x179   : > { %457 = vadd.xlane.f32.xlu0 %v454_v26 }
 0x202   : > { %v456_v27 = vpop.xlane.xlu0 %455 }
 0x203   : > { %v460_v30 = vadd.f32 %v459_v28, %v456_v27 }
 0x206   : > { %v458_v29 = vpop.xlane.xlu0 %457 }
 0x207   : > { %v461_v31 = vadd.f32 %v459_v28, %v458_v29 }
 0x209   : > { %v462_v32 = vmax.f32 %v460_v30, %v461_v31 }
 0x20b   : > { %v463_v33 = vsub.f32 %v460_v30, %v462_v32  ;;  %v466_v34 = vsub.f32 %v461_v31, %v462_v32 }
 0x20d   : > { %v464_v35 = vmul.f32 1.442695, %v463_v33  ;;  %v467_v36 = vmul.f32 1.442695, %v466_v34 }
 0x20f   : > { %723 = vpow2.f32 %v464_v35 }
 0x210   : > { %725 = vpow2.f32 %v467_v36 }
 0x219   : > { %v724_v37 = vpop.eup %723 }
 0x21a   : > { %v726_v38 = vpop.eup %725 }
 0x21b   : > { %v469_v39 = vadd.f32 %v726_v38, %v724_v37 }
 0x21d   : > { %727 = vrcp.f32 %v469_v39 }
 0x227   : > { %v728_v40 = vpop.eup %727 }
 0x228   : > { %v471_v41 = vmul.f32 %v728_v40, %v724_v37  ;;  %v472_v42 = vmul.f32 %v728_v40, %v726_v38 }
 0x22a   : > { %v473_v43 = vmul.f32 %v471_v41, %v320_v10  ;;  %v474_v44 = vmul.f32 %v472_v42, %v321_v7 }
 0x22c   : > { %v475_v45 = vadd.f32 %v474_v44, %v473_v43 }
 0x22e   : > { %476 = vst [vmem:[%s318_s2] sm:$0xff] %v475_v45 }
 0x22f   : > { %830 = shalt.err (!%p827_p1)
}
 0x230   : > { %s831_s13 = scalar_lea.hbm %s1138_s27, 128  ;;  %s835_s28 = scalar_lea.hbm %s1188_s6, 256 }
 0x231   : > { %p832_p6 = scmp.ne.s32.totalorder %s1138_s27, %s831_s13  ;;  %p836_p12 = scmp.lt.u32.totalorder %s1138_s27, %s1188_s6 }
 0x232   : > { %p837_p11 = scmp.lt.u32.totalorder %s835_s28, %s831_s13  ;;  %p839_p10 = scmp.lt.u32.totalorder %s831_s13, %s1138_s27 }
 0x233   : > { %p833_p8 = pnand %p832_p6, %p1207_p13 }
 0x234   : > { %p838_p0 = por %p837_p11, %p836_p12 }
 0x235   : > { %p834_p4 = pneg %p833_p8 }
 0x236   : > { %p840_p3 = por %p839_p10, %p838_p0 }
 0x238   : > { %p841_p7 = pnand %p840_p3, %p834_p4 }
 0x23a   : > { %844 = shalt.err (!%p841_p7)
}
 0x23b   : > { %657 = dma.vmem_to_hbm [thread:$0]  (%p1207_p13), %s1140_s17, 128, %s1138_s27, %s478_s18  }
 0x23c PF: > { %s503_s15 = sand.u32 1, %s879_s23   ;;  %p1208_p9 = scmp.ne.s32.totalorder %s1195_s29, 0 }
 0x23d   : > { %p1209_p2 = scmp.ge.s32.totalorder %s891_s26, 2  ;;  %s504_s16 = scalar_lea.sflag [#allocation5], %s503_s15 }
 0x23f   : > { %p671_p5 = pnand %p1209_p2, %p1208_p9 }
 0x241   : > { %874 = dma.done.wait (!%p671_p5), %s504_s16, 128  }
 0x242   : > { %876 = vsyncadd (!%p671_p5), %s504_s16, 4294967168  ;;  %s1210_s20 = sld [smem:[#allocation14_spill]]  ;;  %p23_p1 = scmp.ge.s32.totalorder %s995_s10, 4  }
 0x243   : > { %s1211_s23 = smov %s883_s24  ;;  %s1212_s24 = smov %s887_s25 }
 0x244   : > { %s1214_s26 = smov %s995_s10  ;;  %25 = sbr.rel (!%p23_p1) target bundleno = 10 (0xa), region = 106 }
 0x248   : > { %s1213_s25 = smov %s1210_s20 }
 0x24b   :  { %509 = vsyncpa [#allocation4], 1 }
 0x24c   :  { %511 = vsyncpa [#allocation4 + $0x1], 1 }
 0x24d   :  { %512 = vsyncpa [#allocation7], 1 }
 0x24e   :  { %514 = vsyncpa [#allocation7 + $0x1], 1 }
 0x24f   :  { %515 = vsyncpa [#allocation5], 1 }
 0x250   :  { %517 = vsyncpa [#allocation5 + $0x1], 1 }

</bundles_post_ra>
